<compile_context>
chip_gen: v7x
topology: tpu7x:2x2x1
jax: 0.10.0
libtpu: 0.0.40
codegen_flags: <defaults>
</compile_context>

<pallas_src>
import jax
import jax.numpy as jnp
from jax.experimental import pallas as pl
from jax.experimental.pallas import tpu as pltpu

SUBLANES = 8           # sublane alignment for the batch (second-minor) axis
MAX_BATCH_TILE = 4096  # per review: 2048-4096 amortizes per-step overhead
SINGLE_TILE_MAX = 512  # below this, a single tile; splitting buys nothing


def _round_up(n, m):
    return ((n + m - 1) // m) * m


def _stable_sigmoid(z):
    # Split-sign sigmoid: never exponentiates a positive argument, so exp()
    # cannot overflow to inf.  exp lives on the EUP; the divide is free filler
    # in this HBM-bound regime.
    ez = jnp.exp(-jnp.abs(z))
    return jnp.where(z >= 0.0, 1.0, ez) / (1.0 + ez)


def _make_mlp_kernel(din, hidden, dout):
    """Kernel for a tiny din->hidden->dout sigmoid MLP.

    The flat parameter vector (row-major [w1, b1, w2, b2]) sits in SMEM; both
    matmuls are unrolled into scalar*vector FMAs on the VPU, so no lane
    padding of x / weights / output is ever needed.
    """
    w1_off = 0
    b1_off = w1_off + din * hidden
    w2_off = b1_off + hidden
    b2_off = w2_off + hidden * dout

    def kernel(params_ref, x_ref, o_ref):
        # x_ref: (TB, din) f32   o_ref: (TB, dout) f32   params_ref: SMEM f32
        xcols = [x_ref[:, k:k + 1] for k in range(din)]

        hcols = []
        for j in range(hidden):
            z = xcols[0] * params_ref[w1_off + j]          # k = 0 term
            for k in range(1, din):
                z = z + xcols[k] * params_ref[w1_off + k * hidden + j]
            hcols.append(_stable_sigmoid(z + params_ref[b1_off + j]))

        for j in range(dout):
            z = hcols[0] * params_ref[w2_off + j]          # k = 0 term
            for k in range(1, hidden):
                z = z + hcols[k] * params_ref[w2_off + k * dout + j]
            o_ref[:, j:j + 1] = _stable_sigmoid(z + params_ref[b2_off + j])

    return kernel


def _choose_batch_tile(batch):
    if batch <= SINGLE_TILE_MAX:
        return _round_up(max(batch, 1), SUBLANES)
    # >= 2 blocks so v7x's two TensorCores both get work on the "parallel"
    # axis; cap at MAX_BATCH_TILE to keep tail padding modest for huge B.
    half = -(-batch // 2)
    return min(MAX_BATCH_TILE, _round_up(half, SUBLANES))


@jax.jit
def neural_network_forward(x, w1, b1, w2, b2):
    """Pallas forward pass matching NeuralNetwork.forward semantics."""
    x = jnp.asarray(x, jnp.float32)
    batch, din = x.shape
    hidden = w1.shape[1]
    dout = w2.shape[1]

    # Flat f32 parameter vector -> SMEM inside the kernel (9 scalars here).
    params = jnp.concatenate([
        jnp.asarray(w1, jnp.float32).reshape(-1),
        jnp.asarray(b1, jnp.float32).reshape(-1),
        jnp.asarray(w2, jnp.float32).reshape(-1),
        jnp.asarray(b2, jnp.float32).reshape(-1),
    ])

    tb = _choose_batch_tile(batch)
    n_blocks = -(-batch // tb)
    padded_batch = n_blocks * tb
    if padded_batch != batch:
        # Ragged-tail padding along the batch axis only; padded rows compute
        # harmless values that are sliced off below (a (B,1) slice is cheap).
        x = jnp.pad(x, ((0, padded_batch - batch), (0, 0)))

    out = pl.pallas_call(
        _make_mlp_kernel(din, hidden, dout),
        out_shape=jax.ShapeDtypeStruct((padded_batch, dout), jnp.float32),
        grid=(n_blocks,),
        in_specs=[
            # Tiny parameter vector: whole thing in SMEM, resident across grid.
            pl.BlockSpec(memory_space=pltpu.MemorySpace.SMEM),
            # x: batch-tiled, un-padded feature dim (= full array extent).
            pl.BlockSpec((tb, din), lambda i: (i, 0)),
        ],
        # Narrow output: (tb, dout) block, full last-dim extent -> 4 B/row.
        out_specs=pl.BlockSpec((tb, dout), lambda i: (i, 0)),
        compiler_params=pltpu.CompilerParams(
            dimension_semantics=("parallel",),   # v7x: shard batch across TCs
        ),
    )(params, x)

    return out[:batch]


def reference_forward(x, w1, b1, w2, b2):
    h = jax.nn.sigmoid(x @ w1 + b1)
    return jax.nn.sigmoid(h @ w2 + b2)


if __name__ == "__main__":
    key = jax.random.PRNGKey(0)
    k1, k2, k3, k4, k5 = jax.random.split(key, 5)

    # Deterministic "torch.randn"-style parameters (shapes from __init__).
    w1 = jax.random.normal(k1, (2, 2), dtype=jnp.float32)
    b1 = jax.random.normal(k2, (2,), dtype=jnp.float32)
    w2 = jax.random.normal(k3, (2, 1), dtype=jnp.float32)
    b2 = jax.random.normal(k4, (1,), dtype=jnp.float32)

    # XOR inputs, as the original script uses (batch=4, features=2).
    x = jnp.array([[0.0, 0.0], [0.0, 1.0], [1.0, 0.0], [1.0, 1.0]],
                  dtype=jnp.float32)

    y_pallas = jax.block_until_ready(neural_network_forward(x, w1, b1, w2, b2))
    y_ref = reference_forward(x, w1, b1, w2, b2)
    assert y_pallas.shape == (4, 1)
    # All-f32 kernel math -> tight tolerance vs. the pure-XLA reference.
    assert jnp.allclose(y_pallas, y_ref, atol=1e-5, rtol=1e-5)

    # Exercise the multi-block grid (>= 2 blocks for v7x) + ragged-tail path.
    xb = jax.random.normal(k5, (10000, 2), dtype=jnp.float32)
    yb_pallas = jax.block_until_ready(
        neural_network_forward(xb, w1, b1, w2, b2))
    yb_ref = reference_forward(xb, w1, b1, w2, b2)
    assert yb_pallas.shape == (10000, 1)
    assert jnp.allclose(yb_pallas, yb_ref, atol=1e-5, rtol=1e-5)

    print("KERNEL_OK")
</pallas_src>

<mosaic_0001>
module attributes {stable_mosaic.version = 11 : i64} {
  func.func @kernel(%arg0: i32, %arg1: memref<9xf32, #tpu.memory_space<smem>>, %arg2: memref<8x2xf32, #tpu.memory_space<vmem>>, %arg3: memref<8x1xf32, #tpu.memory_space<vmem>>) attributes {dimension_semantics = [#tpu.dimension_semantics<parallel>], iteration_bounds = array<i64: 1>, scalar_prefetch = 0 : i64, scratch_operands = 0 : i64, tpu.core_type = #tpu.core_type<tc>, window_params = [{transform_indices = @transform_0, window_bounds = array<i64: 9>}, {transform_indices = @transform_1, window_bounds = array<i64: 8, 2>}, {transform_indices = @transform_2, window_bounds = array<i64: 8, 1>}]} {
    %c0 = arith.constant 0 : index
    %c0_0 = arith.constant 0 : index
    %0 = vector.load %arg2[%c0, %c0_0] : memref<8x2xf32, #tpu.memory_space<vmem>>, vector<8x1xf32>
    %c0_1 = arith.constant 0 : index
    %c1 = arith.constant 1 : index
    %1 = vector.load %arg2[%c0_1, %c1] : memref<8x2xf32, #tpu.memory_space<vmem>>, vector<8x1xf32>
    %c0_2 = arith.constant 0 : index
    %2 = memref.load %arg1[%c0_2] : memref<9xf32, #tpu.memory_space<smem>>
    %3 = vector.broadcast %2 : f32 to vector<8x1xf32>
    %4 = arith.mulf %0, %3 : vector<8x1xf32>
    %c2 = arith.constant 2 : index
    %5 = memref.load %arg1[%c2] : memref<9xf32, #tpu.memory_space<smem>>
    %6 = vector.broadcast %5 : f32 to vector<8x1xf32>
    %7 = arith.mulf %1, %6 : vector<8x1xf32>
    %8 = arith.addf %4, %7 : vector<8x1xf32>
    %c4 = arith.constant 4 : index
    %9 = memref.load %arg1[%c4] : memref<9xf32, #tpu.memory_space<smem>>
    %10 = vector.broadcast %9 : f32 to vector<8x1xf32>
    %11 = arith.addf %8, %10 : vector<8x1xf32>
    %12 = math.absf %11 : vector<8x1xf32>
    %cst = arith.constant 0.000000e+00 : f32
    %13 = vector.broadcast %cst : f32 to vector<8x1xf32>
    %14 = arith.subf %13, %12 : vector<8x1xf32>
    %15 = math.exp %14 : vector<8x1xf32>
    %cst_3 = arith.constant 0.000000e+00 : f32
    %16 = vector.broadcast %cst_3 : f32 to vector<8x1xf32>
    %17 = arith.cmpf oge, %11, %16 : vector<8x1xf32>
    %cst_4 = arith.constant 1.000000e+00 : f32
    %18 = vector.broadcast %cst_4 : f32 to vector<8x1xf32>
    %19 = arith.select %17, %18, %15 : vector<8x1xi1>, vector<8x1xf32>
    %cst_5 = arith.constant 1.000000e+00 : f32
    %20 = vector.broadcast %cst_5 : f32 to vector<8x1xf32>
    %21 = arith.addf %20, %15 : vector<8x1xf32>
    %22 = arith.divf %19, %21 : vector<8x1xf32>
    %c1_6 = arith.constant 1 : index
    %23 = memref.load %arg1[%c1_6] : memref<9xf32, #tpu.memory_space<smem>>
    %24 = vector.broadcast %23 : f32 to vector<8x1xf32>
    %25 = arith.mulf %0, %24 : vector<8x1xf32>
    %c3 = arith.constant 3 : index
    %26 = memref.load %arg1[%c3] : memref<9xf32, #tpu.memory_space<smem>>
    %27 = vector.broadcast %26 : f32 to vector<8x1xf32>
    %28 = arith.mulf %1, %27 : vector<8x1xf32>
    %29 = arith.addf %25, %28 : vector<8x1xf32>
    %c5 = arith.constant 5 : index
    %30 = memref.load %arg1[%c5] : memref<9xf32, #tpu.memory_space<smem>>
    %31 = vector.broadcast %30 : f32 to vector<8x1xf32>
    %32 = arith.addf %29, %31 : vector<8x1xf32>
    %33 = math.absf %32 : vector<8x1xf32>
    %cst_7 = arith.constant 0.000000e+00 : f32
    %34 = vector.broadcast %cst_7 : f32 to vector<8x1xf32>
    %35 = arith.subf %34, %33 : vector<8x1xf32>
    %36 = math.exp %35 : vector<8x1xf32>
    %cst_8 = arith.constant 0.000000e+00 : f32
    %37 = vector.broadcast %cst_8 : f32 to vector<8x1xf32>
    %38 = arith.cmpf oge, %32, %37 : vector<8x1xf32>
    %cst_9 = arith.constant 1.000000e+00 : f32
    %39 = vector.broadcast %cst_9 : f32 to vector<8x1xf32>
    %40 = arith.select %38, %39, %36 : vector<8x1xi1>, vector<8x1xf32>
    %cst_10 = arith.constant 1.000000e+00 : f32
    %41 = vector.broadcast %cst_10 : f32 to vector<8x1xf32>
    %42 = arith.addf %41, %36 : vector<8x1xf32>
    %43 = arith.divf %40, %42 : vector<8x1xf32>
    %c6 = arith.constant 6 : index
    %44 = memref.load %arg1[%c6] : memref<9xf32, #tpu.memory_space<smem>>
    %45 = vector.broadcast %44 : f32 to vector<8x1xf32>
    %46 = arith.mulf %22, %45 : vector<8x1xf32>
    %c7 = arith.constant 7 : index
    %47 = memref.load %arg1[%c7] : memref<9xf32, #tpu.memory_space<smem>>
    %48 = vector.broadcast %47 : f32 to vector<8x1xf32>
    %49 = arith.mulf %43, %48 : vector<8x1xf32>
    %50 = arith.addf %46, %49 : vector<8x1xf32>
    %c8 = arith.constant 8 : index
    %51 = memref.load %arg1[%c8] : memref<9xf32, #tpu.memory_space<smem>>
    %52 = vector.broadcast %51 : f32 to vector<8x1xf32>
    %53 = arith.addf %50, %52 : vector<8x1xf32>
    %54 = math.absf %53 : vector<8x1xf32>
    %cst_11 = arith.constant 0.000000e+00 : f32
    %55 = vector.broadcast %cst_11 : f32 to vector<8x1xf32>
    %56 = arith.subf %55, %54 : vector<8x1xf32>
    %57 = math.exp %56 : vector<8x1xf32>
    %cst_12 = arith.constant 0.000000e+00 : f32
    %58 = vector.broadcast %cst_12 : f32 to vector<8x1xf32>
    %59 = arith.cmpf oge, %53, %58 : vector<8x1xf32>
    %cst_13 = arith.constant 1.000000e+00 : f32
    %60 = vector.broadcast %cst_13 : f32 to vector<8x1xf32>
    %61 = arith.select %59, %60, %57 : vector<8x1xi1>, vector<8x1xf32>
    %cst_14 = arith.constant 1.000000e+00 : f32
    %62 = vector.broadcast %cst_14 : f32 to vector<8x1xf32>
    %63 = arith.addf %62, %57 : vector<8x1xf32>
    %64 = arith.divf %61, %63 : vector<8x1xf32>
    %c0_15 = arith.constant 0 : index
    %c0_16 = arith.constant 0 : index
    %65 = vector.load %arg3[%c0_15, %c0_16] : memref<8x1xf32, #tpu.memory_space<vmem>>, vector<8x1xf32>
    tpu.vector_store %arg3[%c0_15, %c0_16], %64 {strides = array<i32>} : memref<8x1xf32, #tpu.memory_space<vmem>>, vector<8x1xf32>,
    return
  }
  func.func @transform_0(%arg0: i32) -> i32 {
    %c0_i32 = arith.constant 0 : i32
    %c0_i32_0 = arith.constant 0 : i32
    return %c0_i32 : i32
  }
  func.func @transform_1(%arg0: i32) -> (i32, i32) {
    %c0_i32 = arith.constant 0 : i32
    %c0_i32_0 = arith.constant 0 : i32
    return %arg0, %c0_i32 : i32, i32
  }
  func.func @transform_2(%arg0: i32) -> (i32, i32) {
    %c0_i32 = arith.constant 0 : i32
    %c0_i32_0 = arith.constant 0 : i32
    return %arg0, %c0_i32 : i32, i32
  }
}

</mosaic_0001>

<bundles_post_ra>
// kernel: neural_network_forward.1
= control target key start
LH: loop header
LB: loop body
LE: loop exit
PB: predicated region body
PF: predicated region fallthrough
CT: control target
= control target key end

     0   :  { %7 = vsyncpa [#allocation3], 0  ;;  %s159_s0 = inlined_call_operand.vmem [shape: f32[9], index: 0, kind: input, shape index: {}]   ;;  %s160_s1 = inlined_call_operand.vmem [shape: f32[8,2], index: 1, kind: input, shape index: {}]   ;;  %s161_s2 = inlined_call_operand.vmem [shape: f32[8,1], index: 2, kind: output, shape index: {}]  }
   0x1   :  { %s14_s11 = sshll.u32 %s159_s0, 4  ;;  %s15_s11 = int_to_ptr.vmem [resolvable:$true] %s14_s11 }
   0x2   :  { %s119_s12 = scalar_lea.vmem %s15_s11, 16  ;;  %p124_p1 = scmp.lt.s32.totalorder %s15_s11, %s15_s11 }
   0x3   :  { %p120_p0 = scmp.ne.s32.totalorder %s15_s11, %s119_s12  ;;  %p125_p2 = scmp.lt.s32.totalorder %s119_s12, %s119_s12 }
   0x5   :  { %p126_p3 = por %p125_p2, %p124_p1 }
   0x7   :  { %p127_p4 = pnand %p126_p3, %p120_p0 }
   0x9   :  { %130 = shalt.err (!%p127_p4)
}
   0xa   :  { %s133_s13 = smov [#allocation2]  }
   0xb   :  { %17 = dma.vmem_to_smem %s15_s11, 16, %s133_s13, [#allocation3]  }
   0xc   :  { %131 = dma.done.wait [#allocation3], 16  }
   0xd   :  { %132 = vsyncadd [#allocation3], 4294967280 }
   0xe   :  { %23 = sfence }
   0xf   :  { %s97_s14 = sld [smem:[#allocation2 + $0x2]]  ;;  %s100_s15 = sld [smem:[#allocation2 + $0x3]]  ;;  %v24_v0 = vld [vmem:[%s160_s1] sm:$0xff]  ;;  %vm90_vm3 = vcmask 7168  }
  0x10   :  { %s134_s0 = smov 127   ;;  %s25_s18 = sld [smem:[#allocation2]] }
  0x11   :  { %s99_s19 = sld [smem:[#allocation2 + $0x1]]  ;;  %s98_s20 = sld [smem:[#allocation2 + $0x4]] }
  0x12   :  { %s101_s21 = sld [smem:[#allocation2 + $0x5]]  ;;  %s102_s1 = sld [smem:[#allocation2 + $0x6]] }
  0x13   :  { %s103_s22 = sld [smem:[#allocation2 + $0x7]]  ;;  %s104_s23 = sld [smem:[#allocation2 + $0x8]] }
  0x15   :  { %v29_v1 = vstv %s97_s14  ;;  %v52_v3 = vstv %s100_s15 }
  0x16   :  { %v30_v2 = vmul.f32 %v29_v1, %v24_v0  ;;  %v53_v4 = vmul.f32 %v52_v3, %v24_v0  ;;  %v26_v5 = vstv %s25_s18 }
  0x17   :  { %v27_v6 = vmul.f32 %v26_v5, %v24_v0  ;;  %v49_v7 = vstv %s99_s19  ;;  %v37_v8 = vstv %s98_s20 }
  0x18   :  { %32 = vrot.lane.b32.xlu0 %v30_v2, %s134_s0  ;;  %v50_v11 = vmul.f32 %v49_v7, %v24_v0  ;;  %v60_v13 = vstv %s101_s21  ;;  %v72_v31 = vstv %s102_s1 }
  0x19   :  { %v75_v32 = vstv %s103_s22  ;;  %v79_v37 = vstv %s104_s23 }
  0x1c   :  { %55 = vrot.lane.b32.xlu0 %v53_v4, %s134_s0 }
  0x8a   :  { %v33_v9 = vpop.permute.xlu0 %32 }
  0x8b   :  { %v35_v10 = vadd.f32 %v33_v9, %v27_v6 }
  0x8d   :  { %v38_v12 = vadd.f32 %v37_v8, %v35_v10 }
  0x8e   :  { %v56_v14 = vpop.permute.xlu0 %55 }
  0x8f   :  { %v39_v15 = vand.u32 2147483647, %v38_v12  ;;  %v58_v16 = vadd.f32 %v56_v14, %v50_v11  ;;  %vm43_vm0 = vcmp.ge.f32.partialorder %v38_v12, 0.0 }
  0x91   :  { %v40_v17 = vsub.f32 0.0, %v39_v15  ;;  %v61_v18 = vadd.f32 %v60_v13, %v58_v16 }
  0x93   :  { %v41_v19 = vmul.f32 1.442695, %v40_v17  ;;  %v62_v20 = vand.u32 2147483647, %v61_v18  ;;  %vm66_vm1 = vcmp.ge.f32.partialorder %v61_v18, 0.0 }
  0x95   :  { %107 = vpow2.f32 %v41_v19  ;;  %v63_v21 = vsub.f32 0.0, %v62_v20 }
  0x97   :  { %v64_v22 = vmul.f32 1.442695, %v63_v21 }
  0x99   :  { %109 = vpow2.f32 %v64_v22 }
  0x9f   :  { %v108_v23 = vpop.eup %107 }
  0xa0   :  { %v45_v24 = vadd.f32 1.0, %v108_v23  ;;  %v44_v28 = vsel %vm43_vm0, 1.0, %v108_v23 }
  0xa2   :  { %111 = vrcp.f32 %v45_v24 }
  0xa3   :  { %v110_v25 = vpop.eup %109 }
  0xa4   :  { %v68_v26 = vadd.f32 1.0, %v110_v25  ;;  %v67_v33 = vsel %vm66_vm1, 1.0, %v110_v25 }
  0xa6   :  { %113 = vrcp.f32 %v68_v26 }
  0xac   :  { %v112_v27 = vpop.eup %111 }
  0xad   :  { %v47_v29 = vmul.f32 %v112_v27, %v44_v28 }
  0xaf   :  { %v73_v35 = vmul.f32 %v72_v31, %v47_v29 }
  0xb0   :  { %v114_v30 = vpop.eup %113 }
  0xb1   :  { %v70_v34 = vmul.f32 %v114_v30, %v67_v33 }
  0xb3   :  { %v76_v36 = vmul.f32 %v75_v32, %v70_v34 }
  0xb5   :  { %v77_v38 = vadd.f32 %v76_v36, %v73_v35 }
  0xb7   :  { %v80_v39 = vadd.f32 %v79_v37, %v77_v38 }
  0xb9   :  { %v81_v40 = vand.u32 2147483647, %v80_v39  ;;  %vm85_vm2 = vcmp.ge.f32.partialorder %v80_v39, 0.0 }
  0xbb   :  { %v82_v41 = vsub.f32 0.0, %v81_v40 }
  0xbd   :  { %v83_v42 = vmul.f32 1.442695, %v82_v41 }
  0xbf   :  { %115 = vpow2.f32 %v83_v42 }
  0xc9   :  { %v116_v43 = vpop.eup %115 }
  0xca   :  { %v87_v44 = vadd.f32 1.0, %v116_v43  ;;  %v86_v46 = vsel %vm85_vm2, 1.0, %v116_v43 }
  0xcc   :  { %117 = vrcp.f32 %v87_v44 }
  0xd6   :  { %v118_v45 = vpop.eup %117 }
  0xd7   :  { %v89_v47 = vmul.f32 %v118_v45, %v86_v46 }
  0xd9   :  { %91 = vst.msk [vmem:[%s161_s2] sm:$0xff] %vm90_vm3, %v89_v47 }
  0xda   :  { %96 = vsyncpa [#allocation3], 1 }

</bundles_post_ra>
